<compile_context>
chip_gen: v5e
topology: v5e:2x2
jax: 0.10.0
libtpu: 0.0.40
codegen_flags: <defaults>
</compile_context>

<pallas_src>
import functools
import math
from dataclasses import dataclass
from typing import List

import jax
import jax.numpy as jnp
from jax.experimental import pallas as pl
from jax.experimental.pallas import tpu as pltpu

# compiler-params class (name changed across jax versions; prefer the current one)
_CP = getattr(pltpu, "CompilerParams", None) or getattr(pltpu, "TPUCompilerParams")

_VMEM_LIMIT = 48 * 1024 * 1024  # safe on v5e/v6e (128 MiB phys) and v7x (64 MiB phys)


# ----------------------------- config ---------------------------------------
@dataclass
class FluxParams:
    in_channels: int
    vec_in_dim: int
    context_in_dim: int
    hidden_size: int
    mlp_ratio: float
    num_heads: int
    depth: int
    depth_single_blocks: int
    axes_dim: List[int]
    theta: int
    qkv_bias: bool
    guidance_embed: bool


# ----------------------------- helpers ---------------------------------------
def _round_up(x, m):
    return ((x + m - 1) // m) * m


def _pick_tile(n, max_tile=512):
    """Tile for a lane-aligned dim: either the full dim (always legal) or a
    divisor of n that is a multiple of 128 (legal and pipeline-friendly)."""
    if n <= max_tile:
        return n
    for t in (512, 256, 128):
        if n % t == 0:
            return t
    return n


# ----------------------------- Pallas linear (tiled, bf16 x fp32-acc) --------
def _linear_kernel(x_ref, w_ref, b_ref, o_ref, acc_ref):
    kk = pl.program_id(2)

    @pl.when(kk == 0)
    def _():
        # fold the bias into the accumulator init (one broadcast, not per-K-step)
        acc_ref[...] = jnp.broadcast_to(b_ref[...], acc_ref.shape)

    acc_ref[...] += jnp.dot(x_ref[...], w_ref[...],
                            preferred_element_type=jnp.float32)

    @pl.when(kk == pl.num_programs(2) - 1)
    def _():
        o_ref[...] = acc_ref[...].astype(o_ref.dtype)


def linear_pallas(x, w, b):
    """y = x @ w + b for x of shape (..., K), w (K, N), b (N,).
    bf16 operands, fp32 accumulation, output in the caller's dtype."""
    orig_shape = x.shape
    K = orig_shape[-1]
    N = w.shape[1]
    out_dtype = x.dtype

    x2 = x.reshape(-1, K)
    M = x2.shape[0]

    TM = 256 if M >= 256 else _round_up(max(M, 1), 8)
    Mp = _round_up(M, TM)
    TN = _pick_tile(N)
    TK = _pick_tile(K)

    if Mp != M:
        x2 = jnp.pad(x2, ((0, Mp - M), (0, 0)))

    xb = x2.astype(jnp.bfloat16)
    wb = w.astype(jnp.bfloat16)
    b2 = b.reshape(1, N).astype(jnp.float32)

    out = pl.pallas_call(
        _linear_kernel,
        out_shape=jax.ShapeDtypeStruct((Mp, N), out_dtype),
        grid=(Mp // TM, N // TN, K // TK),
        in_specs=[
            pl.BlockSpec((TM, TK), lambda i, j, kk: (i, kk)),
            pl.BlockSpec((TK, TN), lambda i, j, kk: (kk, j)),
            pl.BlockSpec((1, TN), lambda i, j, kk: (0, j)),
        ],
        out_specs=pl.BlockSpec((TM, TN), lambda i, j, kk: (i, j)),
        scratch_shapes=[pltpu.VMEM((TM, TN), jnp.float32)],
        compiler_params=_CP(
            dimension_semantics=("parallel", "parallel", "arbitrary"),
            vmem_limit_bytes=_VMEM_LIMIT,
        ),
    )(xb, wb, b2)
    return out[:M].reshape(*orig_shape[:-1], N)


# ----------------------------- Pallas flash attention ------------------------
def _flash_attn_kernel(q_ref, k_ref, v_ref, bias_ref, o_ref,
                       m_sc, l_sc, acc_sc, *, sm_scale):
    kv = pl.program_id(3)

    @pl.when(kv == 0)
    def _():
        m_sc[...] = jnp.full(m_sc.shape, -jnp.inf, dtype=jnp.float32)
        l_sc[...] = jnp.zeros(l_sc.shape, dtype=jnp.float32)
        acc_sc[...] = jnp.zeros(acc_sc.shape, dtype=jnp.float32)

    q = q_ref[0, 0]                    # (tq, D) bf16
    k = k_ref[0, 0]                    # (tk, D) bf16
    v = v_ref[0, 0]                    # (tk, D) bf16
    bias = bias_ref[0, 0]              # (1, tk) fp32 additive key mask

    s = jax.lax.dot_general(q, k, (((1,), (1,)), ((), ())),
                            preferred_element_type=jnp.float32)
    s = s * sm_scale + bias            # fp32 scores / softmax stats

    m_prev = m_sc[...]
    m_new = jnp.maximum(m_prev, jnp.max(s, axis=-1, keepdims=True))
    alpha = jnp.exp(m_prev - m_new)
    p = jnp.exp(s - m_new)
    l_sc[...] = alpha * l_sc[...] + jnp.sum(p, axis=-1, keepdims=True)
    acc_sc[...] = alpha * acc_sc[...] + jnp.dot(
        p.astype(v.dtype), v, preferred_element_type=jnp.float32)
    m_sc[...] = m_new

    @pl.when(kv == pl.num_programs(3) - 1)
    def _():
        o_ref[0, 0] = (acc_sc[...] *
                       pl.reciprocal(l_sc[...], approx=True)).astype(o_ref.dtype)


def mha_pallas(q, k, v, bias):
    """q,k,v: (B,H,L,D); bias: (B,1,1,L) additive (fp32) -> (B,H,L,D) fp32."""
    B, H, L, D = q.shape
    blk = 128
    Lp = _round_up(L, blk)
    if Lp != L:
        pad = Lp - L
        q = jnp.pad(q, ((0, 0), (0, 0), (0, pad), (0, 0)))
        k = jnp.pad(k, ((0, 0), (0, 0), (0, pad), (0, 0)))
        v = jnp.pad(v, ((0, 0), (0, 0), (0, pad), (0, 0)))
        bias = jnp.pad(bias, ((0, 0), (0, 0), (0, 0), (0, pad)),
                       constant_values=-1e30)
    tq = tk = blk

    qb = q.astype(jnp.bfloat16)
    kb = k.astype(jnp.bfloat16)
    vb = v.astype(jnp.bfloat16)
    bias = bias.astype(jnp.float32)

    kernel = functools.partial(_flash_attn_kernel, sm_scale=1.0 / math.sqrt(D))
    out = pl.pallas_call(
        kernel,
        out_shape=jax.ShapeDtypeStruct((B, H, Lp, D), jnp.float32),
        grid=(B, H, Lp // tq, Lp // tk),
        in_specs=[
            pl.BlockSpec((1, 1, tq, D), lambda b, h, qi, ki: (b, h, qi, 0)),
            pl.BlockSpec((1, 1, tk, D), lambda b, h, qi, ki: (b, h, ki, 0)),
            pl.BlockSpec((1, 1, tk, D), lambda b, h, qi, ki: (b, h, ki, 0)),
            pl.BlockSpec((1, 1, 1, tk), lambda b, h, qi, ki: (b, 0, 0, ki)),
        ],
        out_specs=pl.BlockSpec((1, 1, tq, D), lambda b, h, qi, ki: (b, h, qi, 0)),
        scratch_shapes=[
            pltpu.VMEM((tq, 1), jnp.float32),   # running max
            pltpu.VMEM((tq, 1), jnp.float32),   # running denom
            pltpu.VMEM((tq, D), jnp.float32),   # running output
        ],
        compiler_params=_CP(
            dimension_semantics=("parallel", "parallel", "parallel", "arbitrary"),
            vmem_limit_bytes=_VMEM_LIMIT,
        ),
    )(qb, kb, vb, bias)
    return out[:, :, :L, :]


# ----------------------------- flux building blocks (JAX glue) --------------
def _linear_jax(x, p):
    # tiny (batch-row) matmuls: let XLA fuse these; Pallas launch overhead dominates
    return jnp.dot(x, p["w"], preferred_element_type=jnp.float32) + p["b"]


def timestep_embedding(t, dim, max_period=10000, time_factor=1000.0):
    t = time_factor * t
    half = dim // 2
    freqs = jnp.exp(-math.log(max_period) * jnp.arange(half, dtype=jnp.float32) / half)
    args = t[:, None].astype(jnp.float32) * freqs[None]
    return jnp.concatenate([jnp.cos(args), jnp.sin(args)], axis=-1)


def rope(pos, dim, theta):
    scale = jnp.arange(0, dim, 2, dtype=jnp.float32) / dim
    omega = 1.0 / (theta ** scale)
    out = jnp.einsum("...n,d->...nd", pos.astype(jnp.float32), omega)
    out = jnp.stack([jnp.cos(out), -jnp.sin(out), jnp.sin(out), jnp.cos(out)], axis=-1)
    return out.reshape(*out.shape[:-1], 2, 2)


def embed_nd(ids, axes_dim, theta):
    n_axes = ids.shape[-1]
    emb = jnp.concatenate(
        [rope(ids[..., i], axes_dim[i], theta) for i in range(n_axes)], axis=-3
    )
    return emb[:, None]  # (B, 1, L, pe_dim/2, 2, 2)


def apply_rope(xq, xk, freqs_cis):
    xq_ = xq.reshape(*xq.shape[:-1], -1, 1, 2)
    xk_ = xk.reshape(*xk.shape[:-1], -1, 1, 2)
    xq_out = freqs_cis[..., 0] * xq_[..., 0] + freqs_cis[..., 1] * xq_[..., 1]
    xk_out = freqs_cis[..., 0] * xk_[..., 0] + freqs_cis[..., 1] * xk_[..., 1]
    return xq_out.reshape(xq.shape), xk_out.reshape(xk.shape)


def attention(q, k, v, pe, key_mask):
    q, k = apply_rope(q, k, pe)
    # mask add & softmax stay fp32 inside the kernel (bf16 would overflow -1e30)
    bias = jnp.where(key_mask, 0.0, -1e30).astype(jnp.float32)[:, None, None, :]
    x = mha_pallas(q, k, v, bias)
    B, H, L, D = x.shape
    return jnp.transpose(x, (0, 2, 1, 3)).reshape(B, L, H * D)


def layer_norm(x, eps=1e-6):
    mu = jnp.mean(x, axis=-1, keepdims=True)
    var = jnp.mean((x - mu) ** 2, axis=-1, keepdims=True)
    return (x - mu) * jax.lax.rsqrt(var + eps)


def qk_rms_norm(x, scale):
    rrms = jax.lax.rsqrt(jnp.mean(x * x, axis=-1, keepdims=True) + 1e-6)
    return x * rrms * scale


def split_qkv(qkv, num_heads):
    B, L, _ = qkv.shape
    qkv = qkv.reshape(B, L, 3, num_heads, -1)
    qkv = jnp.transpose(qkv, (2, 0, 3, 1, 4))  # K B H L D
    return qkv[0], qkv[1], qkv[2]


def mlp_embedder(p, x):
    h = _linear_jax(x, p["in"])
    return _linear_jax(jax.nn.silu(h), p["out"])


def modulation(p, vec, multiplier):
    out = _linear_jax(jax.nn.silu(vec), p)[:, None, :]
    return jnp.split(out, multiplier, axis=-1)


def double_block(p, img, txt, vec, pe, img_mask, txt_mask, num_heads):
    i_sh1, i_sc1, i_g1, i_sh2, i_sc2, i_g2 = modulation(p["img_mod"], vec, 6)
    t_sh1, t_sc1, t_g1, t_sh2, t_sc2, t_g2 = modulation(p["txt_mod"], vec, 6)

    img_m = (1 + i_sc1) * layer_norm(img) + i_sh1
    img_qkv = linear_pallas(img_m, p["img_qkv"]["w"], p["img_qkv"]["b"])
    img_q, img_k, img_v = split_qkv(img_qkv, num_heads)
    img_q = qk_rms_norm(img_q, p["img_q_scale"])
    img_k = qk_rms_norm(img_k, p["img_k_scale"])

    txt_m = (1 + t_sc1) * layer_norm(txt) + t_sh1
    txt_qkv = linear_pallas(txt_m, p["txt_qkv"]["w"], p["txt_qkv"]["b"])
    txt_q, txt_k, txt_v = split_qkv(txt_qkv, num_heads)
    txt_q = qk_rms_norm(txt_q, p["txt_q_scale"])
    txt_k = qk_rms_norm(txt_k, p["txt_k_scale"])

    q = jnp.concatenate((txt_q, img_q), axis=2)
    k = jnp.concatenate((txt_k, img_k), axis=2)
    v = jnp.concatenate((txt_v, img_v), axis=2)
    key_mask = jnp.concatenate((txt_mask, img_mask), axis=1)

    attn = attention(q, k, v, pe, key_mask)
    Lt = txt.shape[1]
    txt_attn, img_attn = attn[:, :Lt], attn[:, Lt:]

    img = img + i_g1 * linear_pallas(img_attn, p["img_proj"]["w"], p["img_proj"]["b"])
    img_mlp_in = (1 + i_sc2) * layer_norm(img) + i_sh2
    img_mlp_h = jax.nn.gelu(
        linear_pallas(img_mlp_in, p["img_mlp0"]["w"], p["img_mlp0"]["b"]), approximate=True
    )
    img = img + i_g2 * linear_pallas(img_mlp_h, p["img_mlp2"]["w"], p["img_mlp2"]["b"])

    txt = txt + t_g1 * linear_pallas(txt_attn, p["txt_proj"]["w"], p["txt_proj"]["b"])
    txt_mlp_in = (1 + t_sc2) * layer_norm(txt) + t_sh2
    txt_mlp_h = jax.nn.gelu(
        linear_pallas(txt_mlp_in, p["txt_mlp0"]["w"], p["txt_mlp0"]["b"]), approximate=True
    )
    txt = txt + t_g2 * linear_pallas(txt_mlp_h, p["txt_mlp2"]["w"], p["txt_mlp2"]["b"])
    return img, txt


def single_block(p, x, vec, pe, attn_mask, num_heads, hidden):
    shift, scale, gate = modulation(p["mod"], vec, 3)
    x_mod = (1 + scale) * layer_norm(x) + shift
    lin1 = linear_pallas(x_mod, p["lin1"]["w"], p["lin1"]["b"])
    qkv, mlp_h = lin1[..., : 3 * hidden], lin1[..., 3 * hidden:]
    q, k, v = split_qkv(qkv, num_heads)
    q = qk_rms_norm(q, p["q_scale"])
    k = qk_rms_norm(k, p["k_scale"])
    attn = attention(q, k, v, pe, attn_mask)
    out = linear_pallas(
        jnp.concatenate((attn, jax.nn.gelu(mlp_h, approximate=True)), axis=2),
        p["lin2"]["w"], p["lin2"]["b"],
    )
    return x + gate * out


# ----------------------------- parameter init -------------------------------
def _dense(key, din, dout, zero=False, scale=0.02):
    if zero:
        return {"w": jnp.zeros((din, dout), jnp.float32),
                "b": jnp.zeros((dout,), jnp.float32)}
    kw, kb = jax.random.split(key)
    return {"w": scale * jax.random.normal(kw, (din, dout), jnp.float32),
            "b": scale * jax.random.normal(kb, (dout,), jnp.float32)}


def _double_block_params(key, hidden, mlp_hidden, head_dim):
    ks = jax.random.split(key, 10)
    return {
        "img_mod": _dense(ks[0], hidden, 6 * hidden),
        "txt_mod": _dense(ks[1], hidden, 6 * hidden),
        "img_qkv": _dense(ks[2], hidden, 3 * hidden),
        "txt_qkv": _dense(ks[3], hidden, 3 * hidden),
        "img_q_scale": jnp.ones((head_dim,), jnp.float32),
        "img_k_scale": jnp.ones((head_dim,), jnp.float32),
        "txt_q_scale": jnp.ones((head_dim,), jnp.float32),
        "txt_k_scale": jnp.ones((head_dim,), jnp.float32),
        "img_proj": _dense(ks[4], hidden, hidden),
        "txt_proj": _dense(ks[5], hidden, hidden),
        "img_mlp0": _dense(ks[6], hidden, mlp_hidden),
        "img_mlp2": _dense(ks[7], mlp_hidden, hidden),
        "txt_mlp0": _dense(ks[8], hidden, mlp_hidden),
        "txt_mlp2": _dense(ks[9], mlp_hidden, hidden),
    }


def _single_block_params(key, hidden, mlp_hidden, head_dim):
    ks = jax.random.split(key, 3)
    return {
        "mod": _dense(ks[0], hidden, 3 * hidden),
        "lin1": _dense(ks[1], hidden, 3 * hidden + mlp_hidden),
        "lin2": _dense(ks[2], hidden + mlp_hidden, hidden),
        "q_scale": jnp.ones((head_dim,), jnp.float32),
        "k_scale": jnp.ones((head_dim,), jnp.float32),
    }


def init_controlnet_params(key, cfg, double_depth=2, single_depth=2,
                           backbone_depth=2, backbone_depth_single=1):
    hidden = cfg.hidden_size
    mlp_hidden = int(hidden * cfg.mlp_ratio)
    head_dim = hidden // cfg.num_heads
    ks = iter(jax.random.split(key, 64))
    p = {}
    p["img_in"] = _dense(next(ks), cfg.in_channels, hidden)
    p["cond_img_in"] = _dense(None, cfg.in_channels, hidden, zero=True)  # zero_module
    p["time_in"] = {"in": _dense(next(ks), 256, hidden), "out": _dense(next(ks), hidden, hidden)}
    p["vector_in"] = {"in": _dense(next(ks), cfg.vec_in_dim, hidden), "out": _dense(next(ks), hidden, hidden)}
    if cfg.guidance_embed:
        p["guidance_in"] = {"in": _dense(next(ks), 256, hidden), "out": _dense(next(ks), hidden, hidden)}
    p["txt_in"] = _dense(next(ks), cfg.context_in_dim, hidden)
    p["double_blocks"] = [_double_block_params(next(ks), hidden, mlp_hidden, head_dim)
                          for _ in range(double_depth)]
    p["single_blocks"] = [_single_block_params(next(ks), hidden, mlp_hidden, head_dim)
                          for _ in range(single_depth)]
    p["controlnet_blocks"] = [_dense(None, hidden, hidden, zero=True) for _ in range(backbone_depth)]
    p["single_controlnet_blocks"] = [_dense(None, hidden, hidden, zero=True)
                                     for _ in range(backbone_depth_single)]
    return p


# ----------------------------- ControlNetFlux forward -----------------------
def controlnet_flux_forward(params, cfg, img, img_ids, txt, txt_ids, timesteps,
                            bb_timesteps, y, controlnet_cond=None, guidance=None,
                            txt_mask=None, img_mask=None):
    if img.ndim != 3 or txt.ndim != 3:
        raise ValueError("Input img and txt tensors must have 3 dimensions.")
    img_h = linear_pallas(img, params["img_in"]["w"], params["img_in"]["b"])
    if controlnet_cond is not None:
        img_h = img_h + linear_pallas(controlnet_cond,
                                      params["cond_img_in"]["w"], params["cond_img_in"]["b"])
    vec = mlp_embedder(params["time_in"], timestep_embedding(bb_timesteps, 256))
    if timesteps is not None:
        vec = vec + mlp_embedder(params["time_in"], timestep_embedding(timesteps, 256))
    if cfg.guidance_embed:
        if guidance is None:
            raise ValueError("Didn't get guidance strength for guidance distilled model.")
        vec = vec + mlp_embedder(params["guidance_in"], timestep_embedding(guidance, 256))
    vec = vec + mlp_embedder(params["vector_in"], y)
    txt_h = linear_pallas(txt, params["txt_in"]["w"], params["txt_in"]["b"])

    ids = jnp.concatenate((txt_ids, img_ids), axis=1)
    pe = embed_nd(ids, cfg.axes_dim, cfg.theta)

    double_res = []
    for bp in params["double_blocks"]:
        img_h, txt_h = double_block(bp, img_h, txt_h, vec, pe, img_mask, txt_mask, cfg.num_heads)
        double_res.append(img_h)

    x = jnp.concatenate((txt_h, img_h), axis=1)
    attn_mask = jnp.concatenate((txt_mask, img_mask), axis=1)
    single_res = []
    for bp in params["single_blocks"]:
        x = single_block(bp, x, vec, pe, attn_mask, cfg.num_heads, cfg.hidden_size)
        single_res.append(x)

    out_double = tuple(
        linear_pallas(double_res[i % len(double_res)], cb["w"], cb["b"])
        for i, cb in enumerate(params["controlnet_blocks"])
    )
    out_single = tuple(
        linear_pallas(single_res[i % len(single_res)], cb["w"], cb["b"])
        for i, cb in enumerate(params["single_controlnet_blocks"])
    )
    # TODO(synk): LastLayer decoder path (compute_loss=True and training mode) not implemented.
    return {"double_block_feats": out_double, "single_block_feats": out_single}


# ----------------------------- main ------------------------------------------
if __name__ == "__main__":
    cfg = FluxParams(
        in_channels=8, vec_in_dim=16, context_in_dim=12, hidden_size=32,
        mlp_ratio=4.0, num_heads=2, depth=2, depth_single_blocks=2,
        axes_dim=[4, 6, 6], theta=10000, qkv_bias=True, guidance_embed=False,
    )
    key = jax.random.PRNGKey(0)
    k_par, k_img, k_txt, k_y, k_cond = jax.random.split(key, 5)
    params = init_controlnet_params(k_par, cfg, double_depth=2, single_depth=2,
                                    backbone_depth=2, backbone_depth_single=1)

    B, Li, Lt = 2, 16, 8
    img = jax.random.normal(k_img, (B, Li, cfg.in_channels), jnp.float32)
    txt = jax.random.normal(k_txt, (B, Lt, cfg.context_in_dim), jnp.float32)
    y = jax.random.normal(k_y, (B, cfg.vec_in_dim), jnp.float32)
    controlnet_cond = jax.random.normal(k_cond, (B, Li, cfg.in_channels), jnp.float32)

    hh, ww = jnp.meshgrid(jnp.arange(4), jnp.arange(4), indexing="ij")
    img_ids = jnp.stack([jnp.zeros_like(hh), hh, ww], axis=-1).reshape(1, Li, 3).astype(jnp.float32)
    img_ids = jnp.tile(img_ids, (B, 1, 1))
    txt_ids = jnp.zeros((B, Lt, 3), jnp.float32)

    timesteps = jnp.array([0.25, 0.75], jnp.float32)
    bb_timesteps = jnp.array([0.1, 0.9], jnp.float32)
    txt_mask = jnp.ones((B, Lt), dtype=bool).at[:, -1].set(False)
    img_mask = jnp.ones((B, Li), dtype=bool).at[:, -2:].set(False)

    out = controlnet_flux_forward(
        params, cfg, img, img_ids, txt, txt_ids, timesteps, bb_timesteps, y,
        controlnet_cond=controlnet_cond, guidance=None,
        txt_mask=txt_mask, img_mask=img_mask,
    )
    jax.block_until_ready(out)
    assert len(out["double_block_feats"]) == 2
    assert out["double_block_feats"][0].shape == (B, Li, cfg.hidden_size)
    assert len(out["single_block_feats"]) == 1
    assert out["single_block_feats"][0].shape == (B, Lt + Li, cfg.hidden_size)
    for o in out["double_block_feats"] + out["single_block_feats"]:
        assert bool(jnp.all(jnp.isfinite(o)))
    print("KERNEL_OK")
</pallas_src>

<mosaic_0001>
module attributes {stable_mosaic.version = 11 : i64} {
  func.func @_linear_kernel(%arg0: i32, %arg1: i32, %arg2: i32, %arg3: memref<32x8xbf16, #tpu.memory_space<vmem>>, %arg4: memref<8x32xbf16, #tpu.memory_space<vmem>>, %arg5: memref<1x32xf32, #tpu.memory_space<vmem>>, %arg6: memref<32x32xf32, #tpu.memory_space<vmem>>, %arg7: memref<32x32xf32, #tpu.memory_space<vmem>>) attributes {dimension_semantics = [#tpu.dimension_semantics<parallel>, #tpu.dimension_semantics<parallel>, #tpu.dimension_semantics<arbitrary>], iteration_bounds = array<i64: 1, 1, 1>, scalar_prefetch = 0 : i64, scratch_operands = 1 : i64, tpu.core_type = #tpu.core_type<tc>, window_params = [{transform_indices = @transform_0, window_bounds = array<i64: 32, 8>}, {transform_indices = @transform_1, window_bounds = array<i64: 8, 32>}, {transform_indices = @transform_2, window_bounds = array<i64: 1, 32>}, {transform_indices = @transform_3, window_bounds = array<i64: 32, 32>}]} {
    %c0_i32 = arith.constant 0 : i32
    %0 = arith.cmpi eq, %arg2, %c0_i32 : i32
    %1 = arith.extui %0 : i1 to i32
    %c0_i32_0 = arith.constant 0 : i32
    %2 = arith.cmpi ne, %1, %c0_i32_0 : i32
    scf.if %2 {
      %c0_10 = arith.constant 0 : index
      %c0_11 = arith.constant 0 : index
      %12 = vector.load %arg5[%c0_10, %c0_11] : memref<1x32xf32, #tpu.memory_space<vmem>>, vector<1x32xf32>
      %13 = vector.shape_cast %12 : vector<1x32xf32> to vector<1x32xf32>
      %14 = vector.broadcast %13 : vector<1x32xf32> to vector<32x32xf32>
      %c0_12 = arith.constant 0 : index
      %c0_13 = arith.constant 0 : index
      %15 = vector.load %arg7[%c0_12, %c0_13] : memref<32x32xf32, #tpu.memory_space<vmem>>, vector<32x32xf32>
      tpu.vector_store %arg7[%c0_12, %c0_13], %14 {strides = array<i32>} : memref<32x32xf32, #tpu.memory_space<vmem>>, vector<32x32xf32>,
    } else {
    }
    %c0 = arith.constant 0 : index
    %c0_1 = arith.constant 0 : index
    %3 = vector.load %arg7[%c0, %c0_1] : memref<32x32xf32, #tpu.memory_space<vmem>>, vector<32x32xf32>
    %c0_2 = arith.constant 0 : index
    %c0_3 = arith.constant 0 : index
    %4 = vector.load %arg3[%c0_2, %c0_3] : memref<32x8xbf16, #tpu.memory_space<vmem>>, vector<32x8xbf16>
    %c0_4 = arith.constant 0 : index
    %c0_5 = arith.constant 0 : index
    %5 = vector.load %arg4[%c0_4, %c0_5] : memref<8x32xbf16, #tpu.memory_space<vmem>>, vector<8x32xbf16>
    %cst = arith.constant dense<0.000000e+00> : vector<32x32xf32>
    %6 = tpu.matmul %4, %5, %cst {dimension_numbers = #tpu.dot_dimension_numbers<[1], [0], [0], [1], [0, 0, 1, 1], [], []>} : vector<32x8xbf16>, vector<8x32xbf16>, vector<32x32xf32> -> vector<32x32xf32>
    %7 = arith.addf %3, %6 : vector<32x32xf32>
    %c0_6 = arith.constant 0 : index
    %c0_7 = arith.constant 0 : index
    %8 = vector.load %arg7[%c0_6, %c0_7] : memref<32x32xf32, #tpu.memory_space<vmem>>, vector<32x32xf32>
    tpu.vector_store %arg7[%c0_6, %c0_7], %7 {strides = array<i32>} : memref<32x32xf32, #tpu.memory_space<vmem>>, vector<32x32xf32>,
    %c0_i32_8 = arith.constant 0 : i32
    %9 = arith.cmpi eq, %arg2, %c0_i32_8 : i32
    %10 = arith.extui %9 : i1 to i32
    %c0_i32_9 = arith.constant 0 : i32
    %11 = arith.cmpi ne, %10, %c0_i32_9 : i32
    scf.if %11 {
      %c0_10 = arith.constant 0 : index
      %c0_11 = arith.constant 0 : index
      %12 = vector.load %arg7[%c0_10, %c0_11] : memref<32x32xf32, #tpu.memory_space<vmem>>, vector<32x32xf32>
      %c0_12 = arith.constant 0 : index
      %c0_13 = arith.constant 0 : index
      %13 = vector.load %arg6[%c0_12, %c0_13] : memref<32x32xf32, #tpu.memory_space<vmem>>, vector<32x32xf32>
      tpu.vector_store %arg6[%c0_12, %c0_13], %12 {strides = array<i32>} : memref<32x32xf32, #tpu.memory_space<vmem>>, vector<32x32xf32>,
    } else {
    }
    return
  }
  func.func @transform_0(%arg0: i32, %arg1: i32, %arg2: i32) -> (i32, i32) {
    %c0_i32 = arith.constant 0 : i32
    return %arg0, %arg2 : i32, i32
  }
  func.func @transform_1(%arg0: i32, %arg1: i32, %arg2: i32) -> (i32, i32) {
    %c0_i32 = arith.constant 0 : i32
    return %arg2, %arg1 : i32, i32
  }
  func.func @transform_2(%arg0: i32, %arg1: i32, %arg2: i32) -> (i32, i32) {
    %c0_i32 = arith.constant 0 : i32
    %c0_i32_0 = arith.constant 0 : i32
    return %c0_i32, %arg1 : i32, i32
  }
  func.func @transform_3(%arg0: i32, %arg1: i32, %arg2: i32) -> (i32, i32) {
    %c0_i32 = arith.constant 0 : i32
    return %arg0, %arg1 : i32, i32
  }
}

</mosaic_0001>

<bundles_post_ra>
// kernel: tpu_custom_call.1
= control target key start
LH: loop header
LB: loop body
LE: loop exit
PB: predicated region body
PF: predicated region fallthrough
CT: control target
= control target key end

     0   :  { %vm55_vm0 = vcmask 1043456   ;;  %vm24_vm1 = vcmask 261120   ;;  %vm48_vm2 = vcmask 64512   ;;  %s209_s0 = inlined_call_operand.vmem [shape: bf16[32,8], index: 0, kind: input, shape index: {}]   ;;  %s210_s1 = inlined_call_operand.vmem [shape: bf16[8,32], index: 1, kind: input, shape index: {}]   ;;  %s211_s2 = inlined_call_operand.vmem [shape: f32[1,32], index: 2, kind: input, shape index: {}]   ;;  %s212_s3 = inlined_call_operand.hbm [shape: f32[32,32], index: 3, kind: output, shape index: {}]  }
   0x1   :  { %v37_v0 = vld [vmem:[%s210_s1] sm:$0xf]  ;;  %v127_v2 = vld [vmem:[%s209_s0 + $0x8] sm:$0xff] }
   0x2   :  { %v126_v1 = vld [vmem:[%s209_s0] sm:$0xff]  ;;  %v57_v3 = vsel %vm55_vm0, %v37_v0, 0 }
   0x3   :  { %v132_v4 = vld [vmem:[%s211_s2] ss:$0 sm:$0xff]  ;;  %66 = vmatpush.bf16.msra.mxu0 %v57_v3  ;;  %128 = vmatpush.bf16.msra.mxu1 %v57_v3 }
   0x4   :  { %8 = vsyncpa [#allocation4], 0  ;;  %25 = vst.msk [vmem:[#allocation2] sm:$0xff] %vm24_vm1, %v132_v4  ;;  %s159_s0 = smov [#allocation3]   ;;  %s104_s21 = sshll.u32 %s212_s3, 4  ;;  %s105_s21 = int_to_ptr.hbm [resolvable:$true] %s104_s21 }
   0x5   :  { %26 = vst.msk [vmem:[#allocation2 + $0x8] sm:$0xff] %vm24_vm1, %v132_v4  ;;  %s102_s1 = sshll.u32 %s159_s0, 4  ;;  %s160_s22 = smov 128   ;;  %s103_s1 = int_to_ptr.vmem [resolvable:$true] %s102_s1 }
   0x6   :  { %124 = vmatmul.msk.bf16.vlgmr.msra.gmra.mxu0 %vm48_vm2, %v126_v1  ;;  %125 = vmatmul.msk.bf16.vlgmr.msra.gmra.mxu1 %vm48_vm2, %v127_v2  ;;  %27 = vst.msk [vmem:[#allocation2 + $0x10] sm:$0xff] %vm24_vm1, %v132_v4  ;;  %s161_s23 = smov 8  }
   0x7   :  { %28 = vst.msk [vmem:[#allocation2 + $0x18] sm:$0xff] %vm24_vm1, %v132_v4 }
   0xb   :  { %v29_v5 = vld [vmem:[#allocation2] sm:$0xff] }
   0xc   :  { %v30_v11 = vld [vmem:[#allocation2 + $0x8] sm:$0xff] }
   0xd   :  { %v31_v6 = vld [vmem:[#allocation2 + $0x10] sm:$0xff] }
   0xe   :  { %v32_v12 = vld [vmem:[#allocation2 + $0x18] sm:$0xff] }
  0x83   :  { %v68_v7 = vpop.f32.mrf.mxu0  ;;  %v73_v8 = vpop.f32.mrf.mxu1 }
  0x84   :  { %v78_v9 = vadd.f32 %v68_v7, %v29_v5  ;;  %v80_v10 = vadd.f32 %v73_v8, %v31_v6 }
  0x86   :  { %83 = vst.msk [vmem:[#allocation2] sm:$0xff] %vm24_vm1, %v78_v9 }
  0x87   :  { %85 = vst.msk [vmem:[#allocation2 + $0x10] sm:$0xff] %vm24_vm1, %v80_v10 }
  0x8b   :  { %v70_v13 = vpop.f32.mrf.mxu0  ;;  %v75_v14 = vpop.f32.mrf.mxu1 }
  0x8c   :  { %v79_v15 = vadd.f32 %v70_v13, %v30_v11  ;;  %v81_v16 = vadd.f32 %v75_v14, %v32_v12 }
  0x8d   :  { %v90_v17 = vld [vmem:[#allocation2] sm:$0xff] }
  0x8e   :  { %84 = vst.msk [vmem:[#allocation2 + $0x8] sm:$0xff] %vm24_vm1, %v79_v15  ;;  %v92_v18 = vld [vmem:[#allocation2 + $0x10] sm:$0xff] }
  0x8f   :  { %86 = vst.msk [vmem:[#allocation2 + $0x18] sm:$0xff] %vm24_vm1, %v81_v16 }
  0x90   :  { %94 = vst.msk [vmem:[#allocation3] sm:$0xff] %vm24_vm1, %v90_v17 }
  0x91   :  { %96 = vst.msk [vmem:[#allocation3 + $0x10] sm:$0xff] %vm24_vm1, %v92_v18 }
  0x95   :  { %v91_v19 = vld [vmem:[#allocation2 + $0x8] sm:$0xff] }
  0x96   :  { %v93_v20 = vld [vmem:[#allocation2 + $0x18] sm:$0xff]  ;;  %95 = vst.msk [vmem:[#allocation3 + $0x8] sm:$0xff] %vm24_vm1, %v91_v19 }
  0x97   :  { %97 = vst.msk [vmem:[#allocation3 + $0x18] sm:$0xff] %vm24_vm1, %v93_v20 }
  0x98   :  { %110 = dma.vmem_to_hbm [thread:$0]  %s103_s1, 512, %s105_s21, [#allocation4], %s160_s22, %s160_s22, %s161_s23  }
  0x99   :  { %157 = dma.done.wait [#allocation4], 512  }
  0x9a   :  { %158 = vsyncadd [#allocation4], 4294966784 }
  0x9b   :  { %115 = vsyncpa [#allocation4], 1 }

</bundles_post_ra>
